<compile_context>
chip_gen: v6e
topology: v6e:2x2x1
jax: 0.10.0
libtpu: 0.0.40
codegen_flags: <defaults>
</compile_context>

<pallas_src>
import numpy as np
import jax
import jax.numpy as jnp
from jax.experimental import pallas as pl
from jax.experimental.pallas import tpu as pltpu

BN_EPS = 1e-5
_PAD = 8   # sublane-aligned interior offset inside the conv-padding scratch (f32 tile = 8 rows)


def _linear_upsample_matrix(l_in: int, l_out: int) -> np.ndarray:
    """U (l_out, l_in) s.t. U @ x is 1D linear upsampling, align_corners=True."""
    U = np.zeros((l_out, l_in), dtype=np.float32)
    if l_in == 1:
        U[:, 0] = 1.0
        return U
    for i in range(l_out):
        p = i * (l_in - 1) / (l_out - 1)
        lo = int(np.floor(p))
        hi = min(lo + 1, l_in - 1)
        w = p - lo
        U[i, lo] += 1.0 - w
        U[i, hi] += w
    return U


def _upsample_pad_matrix(l_in: int, l_out: int, l_target: int) -> np.ndarray:
    """(l_target, l_in): linear upsample to l_out rows with F.pad's zero rows folded in."""
    u = _linear_upsample_matrix(l_in, l_out)
    up = np.zeros((l_target, l_in), dtype=np.float32)
    pad_l = (l_target - l_out) // 2
    up[pad_l:pad_l + l_out, :] = u
    return up


# --------------------------------------------------------------------------------------
# Stage 1: upsample(x1) ++ x2  ->  Conv1d(k=3, pad=1) pre-activation + BN1 partial sums
# --------------------------------------------------------------------------------------
def _up_conv1_kernel(x1_ref, x2_ref, ut_ref, w1a_ref, w1b_ref,
                     y1_ref, s1_ref, ss1_ref, pad2_ref, pad1_ref):
    l2 = y1_ref.shape[1]
    cmid = y1_ref.shape[2]

    @pl.when(pl.program_id(0) == 0)
    def _init():
        pad2_ref[...] = jnp.zeros_like(pad2_ref)       # boundary rows give conv padding=1
        pad1_ref[...] = jnp.zeros_like(pad1_ref)
        s1_ref[...] = jnp.zeros_like(s1_ref)
        ss1_ref[...] = jnp.zeros_like(ss1_ref)

    # 1D linear upsample (align_corners=True) with F.pad folded into ut:
    # (L2, L1) @ (L1, C1) keeps channels on the lane axis -> no in-kernel transpose.
    x1u = jnp.dot(ut_ref[...], x1_ref[0], preferred_element_type=jnp.float32)

    # Only the sublane-aligned interior is rewritten every grid step.
    pad2_ref[pl.ds(_PAD, l2), :] = x2_ref[0].astype(jnp.float32)
    pad1_ref[pl.ds(_PAD, l2), :] = x1u

    # torch.cat([x2, x1], dim=C) via W1 split along Cin: 6 accumulating MXU matmuls,
    # bf16 operands, f32 accumulation.
    acc = jnp.zeros((l2, cmid), jnp.float32)
    for k in range(3):
        t2 = pad2_ref[pl.ds(_PAD - 1 + k, l2), :].astype(jnp.bfloat16)
        t1 = pad1_ref[pl.ds(_PAD - 1 + k, l2), :].astype(jnp.bfloat16)
        acc += jnp.dot(t2, w1a_ref[k], preferred_element_type=jnp.float32)
        acc += jnp.dot(t1, w1b_ref[k], preferred_element_type=jnp.float32)

    y1_ref[0] = acc
    # Single-pass BN statistics, accumulated across the (arbitrary) batch grid axis.
    s1_ref[...] += jnp.sum(acc, axis=0, keepdims=True)
    ss1_ref[...] += jnp.sum(acc * acc, axis=0, keepdims=True)


# --------------------------------------------------------------------------------------
# Stage 2: BN1 (fused scale/shift) + ReLU  ->  Conv1d(k=3, pad=1) + BN2 partial sums
# --------------------------------------------------------------------------------------
def _bn_relu_conv2_kernel(y1_ref, sc1_ref, sh1_ref, w2_ref,
                          y2_ref, s2_ref, ss2_ref, pad_ref):
    l2 = y2_ref.shape[1]
    cout = y2_ref.shape[2]

    @pl.when(pl.program_id(0) == 0)
    def _init():
        pad_ref[...] = jnp.zeros_like(pad_ref)
        s2_ref[...] = jnp.zeros_like(s2_ref)
        ss2_ref[...] = jnp.zeros_like(ss2_ref)

    # BN1 applied as fused scale/shift + ReLU, all in f32 (VPU-friendly on v5e).
    h = jnp.maximum(y1_ref[0] * sc1_ref[...] + sh1_ref[...], 0.0)
    pad_ref[pl.ds(_PAD, l2), :] = h

    acc = jnp.zeros((l2, cout), jnp.float32)
    for k in range(3):
        t = pad_ref[pl.ds(_PAD - 1 + k, l2), :].astype(jnp.bfloat16)
        acc += jnp.dot(t, w2_ref[k], preferred_element_type=jnp.float32)

    y2_ref[0] = acc
    s2_ref[...] += jnp.sum(acc, axis=0, keepdims=True)
    ss2_ref[...] += jnp.sum(acc * acc, axis=0, keepdims=True)


# --------------------------------------------------------------------------------------
# Stage 3: BN2 (fused scale/shift) + ReLU, batch-parallel.
# --------------------------------------------------------------------------------------
def _bn_relu_kernel(y2_ref, sc2_ref, sh2_ref, o_ref):
    o_ref[0] = jnp.maximum(y2_ref[0] * sc2_ref[...] + sh2_ref[...], 0.0)


def up_forward(x1_ncl, x2_ncl, params):
    """Up.forward.  x1_ncl: (N, C1, L1), x2_ncl: (N, C2, L2) in PyTorch NCL."""
    w1, g1, b1, w2, g2, b2 = params        # w*: (3, Cin, Cout) ; g/b: (1, C) f32
    n, c1, l1 = x1_ncl.shape
    _, c2, l2 = x2_ncl.shape
    cmid = w1.shape[2]
    cout = w2.shape[2]
    l_up = 2 * l1

    # Upsample + F.pad folded into one (L2, L1) matrix (entries 0/0.5/1: exact in bf16).
    ut = jnp.asarray(_upsample_pad_matrix(l1, l_up, l2), dtype=jnp.bfloat16)

    # Channels-last activations, bf16 MXU operands (halves HBM traffic too).
    x1_nlc = jnp.transpose(x1_ncl, (0, 2, 1)).astype(jnp.bfloat16)
    x2_nlc = jnp.transpose(x2_ncl, (0, 2, 1)).astype(jnp.bfloat16)
    w1a = w1[:, :c2, :].astype(jnp.bfloat16)     # applies to x2 (cat order [x2, x1])
    w1b = w1[:, c2:, :].astype(jnp.bfloat16)     # applies to upsampled x1
    w2b = w2.astype(jnp.bfloat16)

    cp_arb = pltpu.CompilerParams(dimension_semantics=("arbitrary",),
                                  vmem_limit_bytes=32 * 1024 * 1024)
    cp_par = pltpu.CompilerParams(dimension_semantics=("parallel",),
                                  vmem_limit_bytes=32 * 1024 * 1024)
    f32 = jnp.float32

    # ---- stage 1 ----
    y1, s1, ss1 = pl.pallas_call(
        _up_conv1_kernel,
        grid=(n,),
        in_specs=[
            pl.BlockSpec((1, l1, c1), lambda i: (i, 0, 0)),
            pl.BlockSpec((1, l2, c2), lambda i: (i, 0, 0)),
            pl.BlockSpec((l2, l1), lambda i: (0, 0)),
            pl.BlockSpec((3, c2, cmid), lambda i: (0, 0, 0)),
            pl.BlockSpec((3, c1, cmid), lambda i: (0, 0, 0)),
        ],
        out_specs=[
            pl.BlockSpec((1, l2, cmid), lambda i: (i, 0, 0)),
            pl.BlockSpec((1, cmid), lambda i: (0, 0)),
            pl.BlockSpec((1, cmid), lambda i: (0, 0)),
        ],
        out_shape=[
            jax.ShapeDtypeStruct((n, l2, cmid), f32),
            jax.ShapeDtypeStruct((1, cmid), f32),
            jax.ShapeDtypeStruct((1, cmid), f32),
        ],
        scratch_shapes=[
            pltpu.VMEM((l2 + 2 * _PAD, c2), f32),
            pltpu.VMEM((l2 + 2 * _PAD, c1), f32),
        ],
        compiler_params=cp_arb,
    )(x1_nlc, x2_nlc, ut, w1a, w1b)

    # BN1 statistics -> fused per-channel scale/shift (tiny math, done by XLA).
    inv_count = 1.0 / float(n * l2)
    mean1 = s1 * inv_count
    var1 = ss1 * inv_count - mean1 * mean1
    sc1 = g1 * jax.lax.rsqrt(var1 + BN_EPS)
    sh1 = b1 - mean1 * sc1

    # ---- stage 2 ----
    y2, s2, ss2 = pl.pallas_call(
        _bn_relu_conv2_kernel,
        grid=(n,),
        in_specs=[
            pl.BlockSpec((1, l2, cmid), lambda i: (i, 0, 0)),
            pl.BlockSpec((1, cmid), lambda i: (0, 0)),
            pl.BlockSpec((1, cmid), lambda i: (0, 0)),
            pl.BlockSpec((3, cmid, cout), lambda i: (0, 0, 0)),
        ],
        out_specs=[
            pl.BlockSpec((1, l2, cout), lambda i: (i, 0, 0)),
            pl.BlockSpec((1, cout), lambda i: (0, 0)),
            pl.BlockSpec((1, cout), lambda i: (0, 0)),
        ],
        out_shape=[
            jax.ShapeDtypeStruct((n, l2, cout), f32),
            jax.ShapeDtypeStruct((1, cout), f32),
            jax.ShapeDtypeStruct((1, cout), f32),
        ],
        scratch_shapes=[pltpu.VMEM((l2 + 2 * _PAD, cmid), f32)],
        compiler_params=cp_arb,
    )(y1, sc1, sh1, w2b)

    mean2 = s2 * inv_count
    var2 = ss2 * inv_count - mean2 * mean2
    sc2 = g2 * jax.lax.rsqrt(var2 + BN_EPS)
    sh2 = b2 - mean2 * sc2

    # ---- stage 3 ----
    out_nlc = pl.pallas_call(
        _bn_relu_kernel,
        grid=(n,),
        in_specs=[
            pl.BlockSpec((1, l2, cout), lambda i: (i, 0, 0)),
            pl.BlockSpec((1, cout), lambda i: (0, 0)),
            pl.BlockSpec((1, cout), lambda i: (0, 0)),
        ],
        out_specs=pl.BlockSpec((1, l2, cout), lambda i: (i, 0, 0)),
        out_shape=jax.ShapeDtypeStruct((n, l2, cout), f32),
        compiler_params=cp_par,
    )(y2, sc2, sh2)

    return jnp.transpose(out_nlc, (0, 2, 1))   # back to NCL


def up_reference(x1_ncl, x2_ncl, params):
    """Pure-JAX f32 reference mirroring the PyTorch forward (NCL layout)."""
    w1, g1, b1, w2, g2, b2 = params
    n, c1, l1 = x1_ncl.shape
    _, c2, l2 = x2_ncl.shape
    l_up = 2 * l1
    ut = jnp.asarray(_linear_upsample_matrix(l1, l_up).T)
    hi = jax.lax.Precision.HIGHEST
    x1_up = jnp.einsum('ncl,lo->nco', x1_ncl, ut, precision=hi)
    diff = l2 - l_up
    x1_up = jnp.pad(x1_up, ((0, 0), (0, 0), (diff // 2, diff - diff // 2)))
    x = jnp.concatenate([x2_ncl, x1_up], axis=1)

    def cbr(h, w, g, b):
        ll = h.shape[2]
        hp = jnp.pad(h, ((0, 0), (0, 0), (1, 1)))
        y = sum(jnp.einsum('ncl,cm->nml', hp[:, :, k:k + ll], w[k], precision=hi)
                for k in range(3))
        mean = jnp.mean(y, axis=(0, 2), keepdims=True)
        var = jnp.mean((y - mean) ** 2, axis=(0, 2), keepdims=True)
        y = (y - mean) / jnp.sqrt(var + BN_EPS)
        y = y * g.reshape(1, -1, 1) + b.reshape(1, -1, 1)
        return jnp.maximum(y, 0.0)

    return cbr(cbr(x, w1, g1, b1), w2, g2, b2)


if __name__ == "__main__":
    in_channels, out_channels = 8, 4
    n, l1 = 2, 8
    l2 = 2 * l1
    c_skip = in_channels // 2        # channels of x1 and of x2 (UNet skip convention)

    key = jax.random.PRNGKey(0)
    k_x1, k_x2, k_w1, k_w2 = jax.random.split(key, 4)
    x1 = jax.random.normal(k_x1, (n, c_skip, l1), jnp.float32)
    x2 = jax.random.normal(k_x2, (n, c_skip, l2), jnp.float32)

    c_in = 2 * c_skip                # channels after torch.cat  (== in_channels)
    c_mid = in_channels // 2         # DoubleConv mid_channels for bilinear=True
    # Conv1d weights: torch layout (Cout, Cin, K) -> kernel layout (K, Cin, Cout)
    w1_t = 0.2 * jax.random.normal(k_w1, (c_mid, c_in, 3), jnp.float32)
    w2_t = 0.2 * jax.random.normal(k_w2, (out_channels, c_mid, 3), jnp.float32)
    w1 = jnp.transpose(w1_t, (2, 1, 0))
    w2 = jnp.transpose(w2_t, (2, 1, 0))
    # BatchNorm affine params at their default init (weight=1, bias=0)
    g1 = jnp.ones((1, c_mid), jnp.float32)
    b1 = jnp.zeros((1, c_mid), jnp.float32)
    g2 = jnp.ones((1, out_channels), jnp.float32)
    b2 = jnp.zeros((1, out_channels), jnp.float32)
    params = (w1, g1, b1, w2, g2, b2)

    out = up_forward(x1, x2, params)
    out = jax.block_until_ready(out)
    assert out.shape == (n, out_channels, l2), out.shape

    ref = up_reference(x1, x2, params)
    # bf16 MXU operands (f32 accumulation) vs f32 HIGHEST reference -> relaxed tolerance.
    np.testing.assert_allclose(np.asarray(out), np.asarray(ref), rtol=3e-2, atol=3e-2)
    print("KERNEL_OK")
</pallas_src>

<mosaic_0001>
module attributes {stable_mosaic.version = 11 : i64} {
  func.func @_up_conv1_kernel(%arg0: i32, %arg1: memref<1x8x4xbf16, #tpu.memory_space<vmem>>, %arg2: memref<1x16x4xbf16, #tpu.memory_space<vmem>>, %arg3: memref<16x8xbf16, #tpu.memory_space<vmem>>, %arg4: memref<3x4x4xbf16, #tpu.memory_space<vmem>>, %arg5: memref<3x4x4xbf16, #tpu.memory_space<vmem>>, %arg6: memref<1x16x4xf32, #tpu.memory_space<vmem>>, %arg7: memref<1x4xf32, #tpu.memory_space<vmem>>, %arg8: memref<1x4xf32, #tpu.memory_space<vmem>>, %arg9: memref<32x4xf32, #tpu.memory_space<vmem>>, %arg10: memref<32x4xf32, #tpu.memory_space<vmem>>) attributes {dimension_semantics = [#tpu.dimension_semantics<arbitrary>], iteration_bounds = array<i64: 2>, scalar_prefetch = 0 : i64, scratch_operands = 2 : i64, tpu.core_type = #tpu.core_type<tc>, window_params = [{transform_indices = @transform_0, window_bounds = array<i64: 1, 8, 4>}, {transform_indices = @transform_1, window_bounds = array<i64: 1, 16, 4>}, {pipeline_mode = #tpu.pipeline_mode<synchronous>, transform_indices = @transform_2, window_bounds = array<i64: 16, 8>}, {pipeline_mode = #tpu.pipeline_mode<synchronous>, transform_indices = @transform_3, window_bounds = array<i64: 3, 4, 4>}, {pipeline_mode = #tpu.pipeline_mode<synchronous>, transform_indices = @transform_4, window_bounds = array<i64: 3, 4, 4>}, {transform_indices = @transform_5, window_bounds = array<i64: 1, 16, 4>}, {pipeline_mode = #tpu.pipeline_mode<synchronous>, transform_indices = @transform_6, window_bounds = array<i64: 1, 4>}, {pipeline_mode = #tpu.pipeline_mode<synchronous>, transform_indices = @transform_7, window_bounds = array<i64: 1, 4>}]} {
    %c0_i32 = arith.constant 0 : i32
    %0 = arith.cmpi eq, %arg0, %c0_i32 : i32
    %1 = arith.extui %0 : i1 to i32
    %c0_i32_0 = arith.constant 0 : i32
    %2 = arith.cmpi ne, %1, %c0_i32_0 : i32
    scf.if %2 {
      %cst_57 = arith.constant 0.000000e+00 : f32
      %63 = vector.broadcast %cst_57 : f32 to vector<32x4xf32>
      %c0_58 = arith.constant 0 : index
      %c0_59 = arith.constant 0 : index
      %64 = vector.load %arg9[%c0_58, %c0_59] : memref<32x4xf32, #tpu.memory_space<vmem>>, vector<32x4xf32>
      tpu.vector_store %arg9[%c0_58, %c0_59], %63 {strides = array<i32>} : memref<32x4xf32, #tpu.memory_space<vmem>>, vector<32x4xf32>,
      %cst_60 = arith.constant 0.000000e+00 : f32
      %65 = vector.broadcast %cst_60 : f32 to vector<32x4xf32>
      %c0_61 = arith.constant 0 : index
      %c0_62 = arith.constant 0 : index
      %66 = vector.load %arg10[%c0_61, %c0_62] : memref<32x4xf32, #tpu.memory_space<vmem>>, vector<32x4xf32>
      tpu.vector_store %arg10[%c0_61, %c0_62], %65 {strides = array<i32>} : memref<32x4xf32, #tpu.memory_space<vmem>>, vector<32x4xf32>,
      %cst_63 = arith.constant 0.000000e+00 : f32
      %67 = vector.broadcast %cst_63 : f32 to vector<1x4xf32>
      %c0_64 = arith.constant 0 : index
      %c0_65 = arith.constant 0 : index
      %68 = vector.load %arg7[%c0_64, %c0_65] : memref<1x4xf32, #tpu.memory_space<vmem>>, vector<1x4xf32>
      tpu.vector_store %arg7[%c0_64, %c0_65], %67 {strides = array<i32>} : memref<1x4xf32, #tpu.memory_space<vmem>>, vector<1x4xf32>,
      %cst_66 = arith.constant 0.000000e+00 : f32
      %69 = vector.broadcast %cst_66 : f32 to vector<1x4xf32>
      %c0_67 = arith.constant 0 : index
      %c0_68 = arith.constant 0 : index
      %70 = vector.load %arg8[%c0_67, %c0_68] : memref<1x4xf32, #tpu.memory_space<vmem>>, vector<1x4xf32>
      tpu.vector_store %arg8[%c0_67, %c0_68], %69 {strides = array<i32>} : memref<1x4xf32, #tpu.memory_space<vmem>>, vector<1x4xf32>,
    } else {
    }
    %c0 = arith.constant 0 : index
    %c0_1 = arith.constant 0 : index
    %3 = vector.load %arg3[%c0, %c0_1] : memref<16x8xbf16, #tpu.memory_space<vmem>>, vector<16x8xbf16>
    %c0_2 = arith.constant 0 : index
    %c0_3 = arith.constant 0 : index
    %c0_4 = arith.constant 0 : index
    %4 = vector.load %arg1[%c0_2, %c0_3, %c0_4] : memref<1x8x4xbf16, #tpu.memory_space<vmem>>, vector<1x8x4xbf16>
    %5 = vector.shape_cast %4 : vector<1x8x4xbf16> to vector<8x4xbf16>
    %cst = arith.constant dense<0.000000e+00> : vector<16x4xf32>
    %6 = tpu.matmul %3, %5, %cst {dimension_numbers = #tpu.dot_dimension_numbers<[1], [0], [0], [1], [0, 0, 1, 1], [], []>} : vector<16x8xbf16>, vector<8x4xbf16>, vector<16x4xf32> -> vector<16x4xf32>
    %c0_5 = arith.constant 0 : index
    %c0_6 = arith.constant 0 : index
    %c0_7 = arith.constant 0 : index
    %7 = vector.load %arg2[%c0_5, %c0_6, %c0_7] : memref<1x16x4xbf16, #tpu.memory_space<vmem>>, vector<1x16x4xbf16>
    %8 = vector.shape_cast %7 : vector<1x16x4xbf16> to vector<16x4xbf16>
    %9 = arith.extf %8 : vector<16x4xbf16> to vector<16x4xf32>
    %c8 = arith.constant 8 : index
    %c0_8 = arith.constant 0 : index
    %10 = vector.load %arg9[%c8, %c0_8] : memref<32x4xf32, #tpu.memory_space<vmem>>, vector<16x4xf32>
    tpu.vector_store %arg9[%c8, %c0_8], %9 {strides = array<i32>} : memref<32x4xf32, #tpu.memory_space<vmem>>, vector<16x4xf32>,
    %c8_9 = arith.constant 8 : index
    %c0_10 = arith.constant 0 : index
    %11 = vector.load %arg10[%c8_9, %c0_10] : memref<32x4xf32, #tpu.memory_space<vmem>>, vector<16x4xf32>
    tpu.vector_store %arg10[%c8_9, %c0_10], %6 {strides = array<i32>} : memref<32x4xf32, #tpu.memory_space<vmem>>, vector<16x4xf32>,
    %cst_11 = arith.constant 0.000000e+00 : f32
    %12 = vector.broadcast %cst_11 : f32 to vector<16x4xf32>
    %c7 = arith.constant 7 : index
    %c0_12 = arith.constant 0 : index
    %13 = vector.load %arg9[%c7, %c0_12] : memref<32x4xf32, #tpu.memory_space<vmem>>, vector<16x4xf32>
    %14 = arith.truncf %13 : vector<16x4xf32> to vector<16x4xbf16>
    %c7_13 = arith.constant 7 : index
    %c0_14 = arith.constant 0 : index
    %15 = vector.load %arg10[%c7_13, %c0_14] : memref<32x4xf32, #tpu.memory_space<vmem>>, vector<16x4xf32>
    %16 = arith.truncf %15 : vector<16x4xf32> to vector<16x4xbf16>
    %c0_15 = arith.constant 0 : index
    %c0_16 = arith.constant 0 : index
    %c0_17 = arith.constant 0 : index
    %17 = vector.load %arg4[%c0_15, %c0_16, %c0_17] : memref<3x4x4xbf16, #tpu.memory_space<vmem>>, vector<1x4x4xbf16>
    %18 = vector.shape_cast %17 : vector<1x4x4xbf16> to vector<4x4xbf16>
    %cst_18 = arith.constant dense<0.000000e+00> : vector<16x4xf32>
    %19 = tpu.matmul %14, %18, %cst_18 {dimension_numbers = #tpu.dot_dimension_numbers<[1], [0], [0], [1], [0, 0, 1, 1], [], []>} : vector<16x4xbf16>, vector<4x4xbf16>, vector<16x4xf32> -> vector<16x4xf32>
    %20 = arith.addf %12, %19 : vector<16x4xf32>
    %c0_19 = arith.constant 0 : index
    %c0_20 = arith.constant 0 : index
    %c0_21 = arith.constant 0 : index
    %21 = vector.load %arg5[%c0_19, %c0_20, %c0_21] : memref<3x4x4xbf16, #tpu.memory_space<vmem>>, vector<1x4x4xbf16>
    %22 = vector.shape_cast %21 : vector<1x4x4xbf16> to vector<4x4xbf16>
    %cst_22 = arith.constant dense<0.000000e+00> : vector<16x4xf32>
    %23 = tpu.matmul %16, %22, %cst_22 {dimension_numbers = #tpu.dot_dimension_numbers<[1], [0], [0], [1], [0, 0, 1, 1], [], []>} : vector<16x4xbf16>, vector<4x4xbf16>, vector<16x4xf32> -> vector<16x4xf32>
    %24 = arith.addf %20, %23 : vector<16x4xf32>
    %c8_23 = arith.constant 8 : index
    %c0_24 = arith.constant 0 : index
    %25 = vector.load %arg9[%c8_23, %c0_24] : memref<32x4xf32, #tpu.memory_space<vmem>>, vector<16x4xf32>
    %26 = arith.truncf %25 : vector<16x4xf32> to vector<16x4xbf16>
    %c8_25 = arith.constant 8 : index
    %c0_26 = arith.constant 0 : index
    %27 = vector.load %arg10[%c8_25, %c0_26] : memref<32x4xf32, #tpu.memory_space<vmem>>, vector<16x4xf32>
    %28 = arith.truncf %27 : vector<16x4xf32> to vector<16x4xbf16>
    %c1 = arith.constant 1 : index
    %c0_27 = arith.constant 0 : index
    %c0_28 = arith.constant 0 : index
    %29 = vector.load %arg4[%c1, %c0_27, %c0_28] : memref<3x4x4xbf16, #tpu.memory_space<vmem>>, vector<1x4x4xbf16>
    %30 = vector.shape_cast %29 : vector<1x4x4xbf16> to vector<4x4xbf16>
    %cst_29 = arith.constant dense<0.000000e+00> : vector<16x4xf32>
    %31 = tpu.matmul %26, %30, %cst_29 {dimension_numbers = #tpu.dot_dimension_numbers<[1], [0], [0], [1], [0, 0, 1, 1], [], []>} : vector<16x4xbf16>, vector<4x4xbf16>, vector<16x4xf32> -> vector<16x4xf32>
    %32 = arith.addf %24, %31 : vector<16x4xf32>
    %c1_30 = arith.constant 1 : index
    %c0_31 = arith.constant 0 : index
    %c0_32 = arith.constant 0 : index
    %33 = vector.load %arg5[%c1_30, %c0_31, %c0_32] : memref<3x4x4xbf16, #tpu.memory_space<vmem>>, vector<1x4x4xbf16>
    %34 = vector.shape_cast %33 : vector<1x4x4xbf16> to vector<4x4xbf16>
    %cst_33 = arith.constant dense<0.000000e+00> : vector<16x4xf32>
    %35 = tpu.matmul %28, %34, %cst_33 {dimension_numbers = #tpu.dot_dimension_numbers<[1], [0], [0], [1], [0, 0, 1, 1], [], []>} : vector<16x4xbf16>, vector<4x4xbf16>, vector<16x4xf32> -> vector<16x4xf32>
    %36 = arith.addf %32, %35 : vector<16x4xf32>
    %c9 = arith.constant 9 : index
    %c0_34 = arith.constant 0 : index
    %37 = vector.load %arg9[%c9, %c0_34] : memref<32x4xf32, #tpu.memory_space<vmem>>, vector<16x4xf32>
    %38 = arith.truncf %37 : vector<16x4xf32> to vector<16x4xbf16>
    %c9_35 = arith.constant 9 : index
    %c0_36 = arith.constant 0 : index
    %39 = vector.load %arg10[%c9_35, %c0_36] : memref<32x4xf32, #tpu.memory_space<vmem>>, vector<16x4xf32>
    %40 = arith.truncf %39 : vector<16x4xf32> to vector<16x4xbf16>
    %c2 = arith.constant 2 : index
    %c0_37 = arith.constant 0 : index
    %c0_38 = arith.constant 0 : index
    %41 = vector.load %arg4[%c2, %c0_37, %c0_38] : memref<3x4x4xbf16, #tpu.memory_space<vmem>>, vector<1x4x4xbf16>
    %42 = vector.shape_cast %41 : vector<1x4x4xbf16> to vector<4x4xbf16>
    %cst_39 = arith.constant dense<0.000000e+00> : vector<16x4xf32>
    %43 = tpu.matmul %38, %42, %cst_39 {dimension_numbers = #tpu.dot_dimension_numbers<[1], [0], [0], [1], [0, 0, 1, 1], [], []>} : vector<16x4xbf16>, vector<4x4xbf16>, vector<16x4xf32> -> vector<16x4xf32>
    %44 = arith.addf %36, %43 : vector<16x4xf32>
    %c2_40 = arith.constant 2 : index
    %c0_41 = arith.constant 0 : index
    %c0_42 = arith.constant 0 : index
    %45 = vector.load %arg5[%c2_40, %c0_41, %c0_42] : memref<3x4x4xbf16, #tpu.memory_space<vmem>>, vector<1x4x4xbf16>
    %46 = vector.shape_cast %45 : vector<1x4x4xbf16> to vector<4x4xbf16>
    %cst_43 = arith.constant dense<0.000000e+00> : vector<16x4xf32>
    %47 = tpu.matmul %40, %46, %cst_43 {dimension_numbers = #tpu.dot_dimension_numbers<[1], [0], [0], [1], [0, 0, 1, 1], [], []>} : vector<16x4xbf16>, vector<4x4xbf16>, vector<16x4xf32> -> vector<16x4xf32>
    %48 = arith.addf %44, %47 : vector<16x4xf32>
    %c0_44 = arith.constant 0 : index
    %c0_45 = arith.constant 0 : index
    %c0_46 = arith.constant 0 : index
    %49 = vector.load %arg6[%c0_44, %c0_45, %c0_46] : memref<1x16x4xf32, #tpu.memory_space<vmem>>, vector<1x16x4xf32>
    %50 = vector.shape_cast %49 : vector<1x16x4xf32> to vector<16x4xf32>
    %51 = vector.shape_cast %48 : vector<16x4xf32> to vector<1x16x4xf32>
    tpu.vector_store %arg6[%c0_44, %c0_45, %c0_46], %51 {strides = array<i32>} : memref<1x16x4xf32, #tpu.memory_space<vmem>>, vector<1x16x4xf32>,
    %c0_47 = arith.constant 0 : index
    %c0_48 = arith.constant 0 : index
    %52 = vector.load %arg7[%c0_47, %c0_48] : memref<1x4xf32, #tpu.memory_space<vmem>>, vector<1x4xf32>
    %cst_49 = arith.constant dense<0.000000e+00> : vector<4xf32>
    %53 = vector.multi_reduction <add>, %48, %cst_49 [0] : vector<16x4xf32> to vector<4xf32>
    %54 = vector.shape_cast %53 : vector<4xf32> to vector<1x4xf32>
    %55 = arith.addf %52, %54 : vector<1x4xf32>
    %c0_50 = arith.constant 0 : index
    %c0_51 = arith.constant 0 : index
    %56 = vector.load %arg7[%c0_50, %c0_51] : memref<1x4xf32, #tpu.memory_space<vmem>>, vector<1x4xf32>
    tpu.vector_store %arg7[%c0_50, %c0_51], %55 {strides = array<i32>} : memref<1x4xf32, #tpu.memory_space<vmem>>, vector<1x4xf32>,
    %c0_52 = arith.constant 0 : index
    %c0_53 = arith.constant 0 : index
    %57 = vector.load %arg8[%c0_52, %c0_53] : memref<1x4xf32, #tpu.memory_space<vmem>>, vector<1x4xf32>
    %58 = arith.mulf %48, %48 : vector<16x4xf32>
    %cst_54 = arith.constant dense<0.000000e+00> : vector<4xf32>
    %59 = vector.multi_reduction <add>, %58, %cst_54 [0] : vector<16x4xf32> to vector<4xf32>
    %60 = vector.shape_cast %59 : vector<4xf32> to vector<1x4xf32>
    %61 = arith.addf %57, %60 : vector<1x4xf32>
    %c0_55 = arith.constant 0 : index
    %c0_56 = arith.constant 0 : index
    %62 = vector.load %arg8[%c0_55, %c0_56] : memref<1x4xf32, #tpu.memory_space<vmem>>, vector<1x4xf32>
    tpu.vector_store %arg8[%c0_55, %c0_56], %61 {strides = array<i32>} : memref<1x4xf32, #tpu.memory_space<vmem>>, vector<1x4xf32>,
    return
  }
  func.func @transform_0(%arg0: i32) -> (i32, i32, i32) {
    %c0_i32 = arith.constant 0 : i32
    %c0_i32_0 = arith.constant 0 : i32
    %c0_i32_1 = arith.constant 0 : i32
    return %arg0, %c0_i32, %c0_i32_0 : i32, i32, i32
  }
  func.func @transform_1(%arg0: i32) -> (i32, i32, i32) {
    %c0_i32 = arith.constant 0 : i32
    %c0_i32_0 = arith.constant 0 : i32
    %c0_i32_1 = arith.constant 0 : i32
    return %arg0, %c0_i32, %c0_i32_0 : i32, i32, i32
  }
  func.func @transform_2(%arg0: i32) -> (i32, i32) {
    %c0_i32 = arith.constant 0 : i32
    %c0_i32_0 = arith.constant 0 : i32
    %c0_i32_1 = arith.constant 0 : i32
    return %c0_i32, %c0_i32_0 : i32, i32
  }
  func.func @transform_3(%arg0: i32) -> (i32, i32, i32) {
    %c0_i32 = arith.constant 0 : i32
    %c0_i32_0 = arith.constant 0 : i32
    %c0_i32_1 = arith.constant 0 : i32
    %c0_i32_2 = arith.constant 0 : i32
    return %c0_i32, %c0_i32_0, %c0_i32_1 : i32, i32, i32
  }
  func.func @transform_4(%arg0: i32) -> (i32, i32, i32) {
    %c0_i32 = arith.constant 0 : i32
    %c0_i32_0 = arith.constant 0 : i32
    %c0_i32_1 = arith.constant 0 : i32
    %c0_i32_2 = arith.constant 0 : i32
    return %c0_i32, %c0_i32_0, %c0_i32_1 : i32, i32, i32
  }
  func.func @transform_5(%arg0: i32) -> (i32, i32, i32) {
    %c0_i32 = arith.constant 0 : i32
    %c0_i32_0 = arith.constant 0 : i32
    %c0_i32_1 = arith.constant 0 : i32
    return %arg0, %c0_i32, %c0_i32_0 : i32, i32, i32
  }
  func.func @transform_6(%arg0: i32) -> (i32, i32) {
    %c0_i32 = arith.constant 0 : i32
    %c0_i32_0 = arith.constant 0 : i32
    %c0_i32_1 = arith.constant 0 : i32
    return %c0_i32, %c0_i32_0 : i32, i32
  }
  func.func @transform_7(%arg0: i32) -> (i32, i32) {
    %c0_i32 = arith.constant 0 : i32
    %c0_i32_0 = arith.constant 0 : i32
    %c0_i32_1 = arith.constant 0 : i32
    return %c0_i32, %c0_i32_0 : i32, i32
  }
}

</mosaic_0001>

<bundles_post_ra>
// kernel: tpu_custom_call.1
= control target key start
LH: loop header
LB: loop body
LE: loop exit
PB: predicated region body
PF: predicated region fallthrough
CT: control target
= control target key end

     0   :  { %13 = vsyncpa [#allocation5], 0  ;;  %s1184_s0 = inlined_call_operand.vmem [shape: bf16[2,8,4], index: 0, kind: input, shape index: {}]   ;;  %s1185_s1 = inlined_call_operand.vmem [shape: bf16[2,16,4], index: 1, kind: input, shape index: {}]   ;;  %s1186_s2 = inlined_call_operand.vmem [shape: bf16[16,8], index: 2, kind: input, shape index: {}]   ;;  %s1187_s3 = inlined_call_operand.vmem [shape: bf16[3,4,4], index: 3, kind: input, shape index: {}]   ;;  %s1188_s4 = inlined_call_operand.vmem [shape: bf16[3,4,4], index: 4, kind: input, shape index: {}]   ;;  %s1189_s5 = inlined_call_operand.vmem [shape: f32[2,16,4], index: 5, kind: output, shape index: {0}]   ;;  %s1190_s6 = inlined_call_operand.hbm [shape: f32[1,4], index: 6, kind: output, shape index: {1}]   ;;  %s1191_s7 = inlined_call_operand.hbm [shape: f32[1,4], index: 7, kind: output, shape index: {2}]  }
   0x1   :  { %14 = vsyncpa [#allocation7], 0  ;;  %s1063_s24 = smov 0  }
   0x2 LB: > { %s1069_s25 = sadd.s32 4294967295, %s1016_s24   ;;  %p841_p0 = scmp.ge.s32.totalorder %s1016_s24, 1  ;;  %s1016_s24 = sphi %s1063_s24, %s20_s24  }
   0x3   : > { %p243_p1 = scmp.lt.s32.totalorder %s1016_s24, 3 }
   0x5   : > { %p244_p2 = pnand %p841_p0, %p243_p1 }
   0x6   : > { %p279_p3 = scmp.lt.s32.totalorder (!%p244_p2), %s1069_s25, 1  ;;  %p847_p4 = scmp.ne.s32.totalorder (!%p244_p2), %s1069_s25, 0 }
   0x7   : > { %247 = sbr.rel (%p244_p2) target bundleno = 488 (0x1e8), region = 40 }
   0xc   : > { %s280_s26 = scalar_select %p279_p3, %s1069_s25, 1 }
   0xd   : > { %297 = sbr.rel (%p847_p4) target bundleno = 24 (0x18), region = 44 }
   0xe   : > { %s842_s27 = sshll.u32 %s280_s26, 2  ;;  %s866_s28 = sshll.u32 %s280_s26, 3 }
   0xf   : > { %s282_s8 = scalar_lea.vmem %s1184_s0, %s842_s27  ;;  %s1081_s11 = scalar_lea.vmem %s1185_s1, %s866_s28 }
  0x10   : > { %s867_s12 = sshll.u32 %s280_s26, 4 }
  0x11   : > { %s1086_s15 = scalar_lea.vmem %s1189_s5, %s867_s12 }
  0x12   : > { %vm298_vm0 = vcmask 31744   ;;  %vm307_vm1 = vcmask 24576   ;;  %v1018_v0 = vmov 0.0  }
  0x13   : > { %299 = vst.msk [vmem:[#allocation2] sm:$0xff] %vm298_vm0, %v1018_v0  ;;  %300 = vst.msk [vmem:[#allocation2 + $0x8] sm:$0xff] %vm298_vm0, %v1018_v0 }
  0x14   : > { %301 = vst.msk [vmem:[#allocation2 + $0x10] sm:$0xff] %vm298_vm0, %v1018_v0  ;;  %302 = vst.msk [vmem:[#allocation2 + $0x18] sm:$0xff] %vm298_vm0, %v1018_v0 }
  0x15   : > { %303 = vst.msk [vmem:[#allocation3] sm:$0xff] %vm298_vm0, %v1018_v0  ;;  %304 = vst.msk [vmem:[#allocation3 + $0x8] sm:$0xff] %vm298_vm0, %v1018_v0 }
  0x16   : > { %305 = vst.msk [vmem:[#allocation3 + $0x10] sm:$0xff] %vm298_vm0, %v1018_v0  ;;  %306 = vst.msk [vmem:[#allocation3 + $0x18] sm:$0xff] %vm298_vm0, %v1018_v0 }
  0x17   : > { %308 = vst.msk [vmem:[#allocation4] sm:$0x1] %vm307_vm1, %v1018_v0  ;;  %309 = vst.msk [vmem:[#allocation6] sm:$0x1] %vm307_vm1, %v1018_v0 }
  0x18 PF: > { %v312_v1 = vld [vmem:[%s282_s8] sm:$0xf]  ;;  %vm322_vm2 = vcmask 1043456   ;;  %v1019_v2 = vmov 0.0   ;;  %vm1020_vm3 = vmmov 0   ;;  %vm318_vm4 = vcmask 64512  }
  0x19   : > { %886 = vmatprep.subr.bf16.mxu0 %v1019_v2  ;;  %v324_v3 = vsel %vm322_vm2, %v312_v1, 0  ;;  %888 = vmatprep.mubr.msk.bf16.mxu0 %vm1020_vm3, %v1019_v2  ;;  %v953_v4 = vld [vmem:[%s1186_s2] sm:$0xff]   ;;  %vm371_vm5 = vcmask 31744   ;;  %vm387_vm6 = vcmask 1041408   ;;  %s1021_s9 = smov [#allocation4]   ;;  %vm708_vm7 = vcmask 24576  }
  0x1a   : > { %887 = vmatpush3.bf16.msra.mxu0 %v324_v3  ;;  %892 = vmatprep.subr.bf16.mxu1 %v1019_v2  ;;  %v869_v5 = vld [vmem:[%s1081_s11] sm:$0xff]   ;;  %s739_s10 = sshll.u32 %s1021_s9, 4  ;;  %p936_p5 = scmp.eq.s32.totalorder %s1069_s25, 1  ;;  %s740_s10 = int_to_ptr.vmem [resolvable:$true] %s739_s10 }
  0x1b   : > { %898 = vmatprep.subr.bf16.mxu0 %v1019_v2  ;;  %894 = vmatprep.mubr.msk.bf16.mxu1 %vm1020_vm3, %v1019_v2  ;;  %v870_v6 = vunpack.c.l.bf16 %v869_v5  ;;  %v871_v7 = vunpack.c.h.bf16 %v869_v5  ;;  %v382_v8 = vld [vmem:[%s1187_s3] sm:$0x3]  ;;  %v854_v14 = vld [vmem:[%s1188_s4 + $0x2] sm:$0x3]  ;;  %v858_v22 = vld [vmem:[%s1188_s4 + $0x4] sm:$0x3]  ;;  %p961_p9 = scmp.lt.s32.totalorder %s740_s10, %s740_s10 }
  0x1c   : > { %v436_v9 = vsel %vm387_vm6, %v382_v8, 0  ;;  %v383_v13 = vld [vmem:[%s1188_s4] sm:$0x3]  ;;  %v542_v16 = vsel %vm387_vm6, %v854_v14, 0  ;;  %v852_v21 = vld [vmem:[%s1187_s3 + $0x2] sm:$0x3] }
  0x1d   : > { %889 = vmatmul.mubr.msk.bf16.vlgmr.msra.gmra.mxu0 %vm318_vm4, %v953_v4  ;;  %372 = vst.msk [vmem:[#allocation2 + $0x8] sm:$0xff] %vm371_vm5, %v870_v6  ;;  %373 = vst.msk [vmem:[#allocation2 + $0x10] sm:$0xff] %vm371_vm5, %v871_v7  ;;  %v389_v15 = vsel %vm387_vm6, %v383_v13, 0  ;;  %v491_v28 = vsel %vm387_vm6, %v852_v21, 0  ;;  %v650_v30 = vsel %vm387_vm6, %v858_v22, 0  ;;  %s1022_s11 = smov [#allocation6]  }
  0x1e   : > { %900 = vmatprep.mubr.msk.bf16.mxu0 %vm1020_vm3, %v1019_v2  ;;  %899 = vmatpush3.bf16.msra.mxu0 %v436_v9  ;;  %v856_v33 = vld [vmem:[%s1187_s3 + $0x4] sm:$0x3]  ;;  %s750_s12 = sshll.u32 %s1022_s11, 4  ;;  %s954_s13 = scalar_lea.vmem %s740_s10, 16  ;;  %s751_s12 = int_to_ptr.vmem [resolvable:$true] %s750_s12 }
  0x1f   : > { %910 = vmatprep.subr.bf16.mxu0 %v1019_v2  ;;  %893 = vmatpush3.bf16.msra.mxu1 %v389_v15  ;;  %v599_v37 = vsel %vm387_vm6, %v856_v33, 0  ;;  %p955_p6 = scmp.ne.s32.totalorder %s740_s10, %s954_s13  ;;  %s960_s14 = scalar_lea.vmem %s740_s10, 32 }
  0x20   : > { %904 = vmatprep.subr.bf16.mxu1 %v1019_v2  ;;  %p962_p10 = scmp.lt.s32.totalorder %s960_s14, %s954_s13 }
  0x21   : > { %p956_p7 = pnand %p955_p6, %p936_p5 }
  0x22   : > { %p963_p11 = por %p962_p10, %p961_p9 }
  0x23   : > { %p957_p8 = pneg %p956_p7 }
  0x24   : > { %v376_v10 = vld [vmem:[#allocation2 + $0x7] sm:$0xff]  ;;  %v377_v11 = vld [vmem:[#allocation2 + $0xf] sm:$0xff] }
  0x25   : > { %v378_v12 = vpack.c.bf16 %v377_v11, %v376_v10  ;;  %v479_v31 = vld [vmem:[#allocation2 + $0x8] sm:$0xff]  ;;  %v480_v32 = vld [vmem:[#allocation2 + $0x10] sm:$0xff]  ;;  %p964_p12 = pnand %p963_p11, %p957_p8 }
  0x26   : > { %v481_v36 = vpack.c.bf16 %v480_v32, %v479_v31  ;;  %v587_v39 = vld [vmem:[#allocation2 + $0x9] sm:$0xff]  ;;  %v588_v40 = vld [vmem:[#allocation2 + $0x11] sm:$0xff]  ;;  %v710_v32 = vld [vmem:[#allocation6] sm:$0x1] }
  0x27   : > { %901 = vmatmul.mubr.msk.bf16.vlgmr.msra.gmra.mxu0 %vm371_vm5, %v378_v12  ;;  %v589_v41 = vpack.c.bf16 %v588_v40, %v587_v39 }
  0x28   : > { %911 = vmatpush3.bf16.msra.mxu0 %v542_v16  ;;  %912 = vmatprep.mubr.msk.bf16.mxu0 %vm1020_vm3, %v1019_v2 }
  0x29   : > { %922 = vmatprep.subr.bf16.mxu0 %v1019_v2 }
  0xdd   : > { %v360_v17 = vpop.f32.mrf.mxu0 }
  0xde   : > { %374 = vst.msk [vmem:[#allocation3 + $0x8] sm:$0xff] %vm371_vm5, %v360_v17 }
  0xdf   : > { %v890_v18 = vpop.f32.mrf.mxu0 }
  0xe1   : > { %v363_v19 = vpop.f32.mrf.mxu0 }
  0xe2   : > { %375 = vst.msk [vmem:[#allocation3 + $0x10] sm:$0xff] %vm371_vm5, %v363_v19 }
  0xe3   : > { %v891_v20 = vpop.f32.mrf.mxu0 }
  0xe5   : > { %v379_v23 = vld [vmem:[#allocation3 + $0x7] sm:$0xff] }
  0xe6   : > { %v482_v25 = vld [vmem:[#allocation3 + $0x8] sm:$0xff] }
  0xe7   : > { %v472_v42 = vpop.f32.mrf.mxu0 }
  0xe9   : > { %v380_v24 = vld [vmem:[#allocation3 + $0xf] sm:$0xff]  ;;  %v902_v43 = vpop.f32.mrf.mxu0 }
  0xea   : > { %v483_v26 = vld [vmem:[#allocation3 + $0x10] sm:$0xff]  ;;  %v381_v27 = vpack.c.bf16 %v380_v24, %v379_v23 }
  0xeb   : > { %v484_v29 = vpack.c.bf16 %v483_v26, %v482_v25  ;;  %v590_v34 = vld [vmem:[#allocation3 + $0x9] sm:$0xff]  ;;  %v591_v35 = vld [vmem:[#allocation3 + $0x11] sm:$0xff]  ;;  %v475_v44 = vpop.f32.mrf.mxu0 }
  0xec   : > { %895 = vmatmul.mubr.msk.bf16.vlgmr.msra.gmra.mxu1 %vm371_vm5, %v381_v27  ;;  %v592_v38 = vpack.c.bf16 %v591_v35, %v590_v34 }
  0xed   : > { %913 = vmatmul.mubr.msk.bf16.vlgmr.msra.gmra.mxu0 %vm371_vm5, %v484_v29  ;;  %905 = vmatpush3.bf16.msra.mxu1 %v491_v28  ;;  %v903_v45 = vpop.f32.mrf.mxu0  ;;  %v697_v29 = vld [vmem:[#allocation4] sm:$0x1] }
  0xee   : > { %923 = vmatpush3.bf16.msra.mxu0 %v650_v30  ;;  %906 = vmatprep.mubr.msk.bf16.mxu1 %vm1020_vm3, %v1019_v2 }
  0xef   : > { %916 = vmatprep.subr.bf16.mxu1 %v1019_v2  ;;  %924 = vmatprep.mubr.msk.bf16.mxu0 %vm1020_vm3, %v1019_v2 }
  0xf4   : > { %907 = vmatmul.mubr.msk.bf16.vlgmr.msra.gmra.mxu1 %vm371_vm5, %v481_v36 }
  0xf5   : > { %925 = vmatmul.mubr.msk.bf16.vlgmr.msra.gmra.mxu0 %vm371_vm5, %v592_v38  ;;  %917 = vmatpush3.bf16.msra.mxu1 %v599_v37 }
  0xf6   : > { %918 = vmatprep.mubr.msk.bf16.mxu1 %vm1020_vm3, %v1019_v2 }
  0xfc   : > { %919 = vmatmul.mubr.msk.bf16.vlgmr.msra.gmra.mxu1 %vm371_vm5, %v589_v41 }
 0x1ac   : > { %v425_v46 = vpop.f32.mrf.mxu1 }
 0x1ad   : > { %v578_v47 = vpop.f32.mrf.mxu0  ;;  %v473_v56 = vadd.f32 %v472_v42, %v425_v46 }
 0x1ae   : > { %v896_v48 = vpop.f32.mrf.mxu1 }
 0x1af   : > { %v914_v49 = vpop.f32.mrf.mxu0 }
 0x1b0   : > { %v428_v50 = vpop.f32.mrf.mxu1 }
 0x1b1   : > { %v581_v51 = vpop.f32.mrf.mxu0  ;;  %v476_v62 = vadd.f32 %v475_v44, %v428_v50 }
 0x1b2   : > { %v897_v52 = vpop.f32.mrf.mxu1 }
 0x1b3   : > { %v915_v53 = vpop.f32.mrf.mxu0 }
 0x1b4   : > { %v527_v54 = vpop.f32.mrf.mxu1 }
 0x1b5   : > { %v686_v55 = vpop.f32.mrf.mxu0  ;;  %v534_v59 = vadd.f32 %v527_v54, %v473_v56 }
 0x1b6   : > { %v908_v57 = vpop.f32.mrf.mxu1 }
 0x1b7   : > { %v926_v58 = vpop.f32.mrf.mxu0  ;;  %v585_v2 = vadd.f32 %v578_v47, %v534_v59 }
 0x1b8   : > { %v530_v60 = vpop.f32.mrf.mxu1 }
 0x1b9   : > { %v689_v61 = vpop.f32.mrf.mxu0  ;;  %v535_v1 = vadd.f32 %v530_v60, %v476_v62 }
 0x1ba   : > { %v909_v63 = vpop.f32.mrf.mxu1 }
 0x1bb   : > { %v927_v0 = vpop.f32.mrf.mxu0  ;;  %v586_v7 = vadd.f32 %v581_v51, %v535_v1 }
 0x1bc   : > { %v635_v3 = vpop.f32.mrf.mxu1 }
 0x1bd   : > { %v642_v4 = vadd.f32 %v635_v3, %v585_v2 }
 0x1be   : > { %v920_v5 = vpop.f32.mrf.mxu1 }
 0x1bf   : > { %v693_v6 = vadd.f32 %v686_v55, %v642_v4 }
 0x1c0   : > { %v638_v8 = vpop.f32.mrf.mxu1 }
 0x1c1   : > { %695 = vst.msk [vmem:[%s1086_s15] sm:$0xff] %vm371_vm5, %v693_v6  ;;  %v643_v9 = vadd.f32 %v638_v8, %v586_v7  ;;  %v711_v11 = vmul.f32 %v693_v6, %v693_v6  ;;  %v698_v13 = vsel %vm371_vm5, %v693_v6, 0.0 }
 0x1c2   : > { %v921_v10 = vpop.f32.mrf.mxu1 }
 0x1c3   : > { %v694_v12 = vadd.f32 %v689_v61, %v643_v9  ;;  %v713_v17 = vsel %vm371_vm5, %v711_v11, 0.0 }
 0x1c5   : > { %696 = vst.msk [vmem:[%s1086_s15 + $0x8] sm:$0xff] %vm371_vm5, %v694_v12  ;;  %v699_v14 = vsel %vm371_vm5, %v694_v12, 0.0  ;;  %v712_v15 = vmul.f32 %v694_v12, %v694_v12 }
 0x1c6   : > { %v700_v16 = vadd.f32 %v699_v14, %v698_v13 }
 0x1c7   : > { %v714_v18 = vsel %vm371_vm5, %v712_v15, 0.0 }
 0x1c8   : > { %v701_v19 = vrot.slane %v700_v16, 4  ;;  %v715_v20 = vadd.f32 %v714_v18, %v713_v17 }
 0x1ca   : > { %v702_v21 = vadd.f32 %v701_v19, %v700_v16  ;;  %v716_v22 = vrot.slane %v715_v20, 4 }
 0x1cc   : > { %v703_v23 = vrot.slane %v702_v21, 2  ;;  %v717_v24 = vadd.f32 %v716_v22, %v715_v20 }
 0x1ce   : > { %v704_v25 = vadd.f32 %v703_v23, %v702_v21  ;;  %v718_v26 = vrot.slane %v717_v24, 2 }
 0x1d0   : > { %v705_v27 = vrot.slane %v704_v25, 1  ;;  %v719_v28 = vadd.f32 %v718_v26, %v717_v24 }
 0x1d2   : > { %v706_v30 = vadd.f32 %v705_v27, %v704_v25  ;;  %v720_v31 = vrot.slane %v719_v28, 1 }
 0x1d4   : > { %v707_v33 = vadd.f32 %v706_v30, %v697_v29  ;;  %v721_v34 = vadd.f32 %v720_v31, %v719_v28 }
 0x1d6   : > { %709 = vst.msk [vmem:[#allocation4] sm:$0x1] %vm708_vm7, %v707_v33  ;;  %v722_v35 = vadd.f32 %v721_v34, %v710_v32 }
 0x1d7   : > { %967 = shalt.err (!%p964_p12)
}
 0x1d8   : > { %929 = dma.vmem_to_hbm [thread:$0]  (%p936_p5), %s740_s10, 16, %s1190_s6, [#allocation5]   ;;  %723 = vst.msk [vmem:[#allocation6] sm:$0x1] %vm708_vm7, %v722_v35 }
 0x1d9   : > { %s978_s17 = scalar_lea.vmem %s751_s12, 16  ;;  %s984_s18 = scalar_lea.vmem %s751_s12, 32 }
 0x1da   : > { %p979_p13 = scmp.ne.s32.totalorder %s751_s12, %s978_s17  ;;  %p985_p2 = scmp.lt.s32.totalorder %s751_s12, %s751_s12 }
 0x1db   : > { %p986_p3 = scmp.lt.s32.totalorder %s984_s18, %s978_s17 }
 0x1dc   : > { %p980_p0 = pnand %p979_p13, %p936_p5 }
 0x1dd   : > { %p987_p4 = por %p986_p3, %p985_p2 }
 0x1de   : > { %p981_p1 = pneg %p980_p0 }
 0x1e0   : > { %p988_p6 = pnand %p987_p4, %p981_p1 }
 0x1e2   : > { %991 = shalt.err (!%p988_p6)
}
 0x1e3   : > { %931 = dma.vmem_to_hbm [thread:$0]  (%p936_p5), %s751_s12, 16, %s1191_s7, [#allocation7]  }
 0x1e4   : > { %1007 = dma.done.wait (%p936_p5), [#allocation5], 16  }
 0x1e5   : > { %1009 = vsyncadd (%p936_p5), [#allocation5], 4294967280 }
 0x1e6   : > { %1011 = dma.done.wait (%p936_p5), [#allocation7], 16  }
 0x1e7   : > { %1013 = vsyncadd (%p936_p5), [#allocation7], 4294967280 }
 0x1e8 PF: > { %s20_s24 = sadd.s32 1, %s1016_s24  }
 0x1e9   : > { %p17_p7 = scmp.ge.s32.totalorder %s20_s24, 4  }
 0x1eb   :  { %19 = sbr.rel (!%p17_p7) target bundleno = 2 (0x2), region = 98 }
 0x1f0   :  { %775 = vsyncpa [#allocation5], 1 }
 0x1f1   :  { %777 = vsyncpa [#allocation5 + $0x1], 1 }
 0x1f2   :  { %778 = vsyncpa [#allocation7], 1 }

</bundles_post_ra>
